<compile_context>
chip_gen: v6e
topology: v6e:2x2x1
jax: 0.10.0
libtpu: 0.0.40
codegen_flags: <defaults>
</compile_context>

<pallas_src>
import math

import jax
import jax.numpy as jnp
from jax.experimental import pallas as pl
from jax.experimental.pallas import tpu as pltpu


# --------------------------------------------------------------------------
# layout helpers
# --------------------------------------------------------------------------
def _periods_per_row(b, n, d, max_lane=4096):
    """k = number of consecutive d-vectors packed into one lane-dense row.

    Chosen so that (d*k) % 128 == 0, k divides b*n and d*k <= max_lane.
    Falls back to 1 (plain (b*n, d) flattening) when no such k exists.
    """
    bn = b * n
    k0 = 128 // math.gcd(d, 128)          # minimal k making d*k lane-dense
    best = 1
    if bn % k0 == 0:
        k = k0
        while d * k <= max_lane:
            if bn % k == 0:
                best = k
            k += k0
    return best


def _choose_row_tile(rows, lanes, elem_bytes, target_block_bytes=2 << 20):
    """Row-tile size: ~2 MiB blocks (safe for double-buffering on all gens)."""
    max_rows = max(8, target_block_bytes // (lanes * elem_bytes))
    if rows <= max_rows:
        if rows >= 16:
            # split into >=2 tiles so the 'parallel' grid axis can shard
            # across v7x's two TensorCores; keep tiles a multiple of 8.
            half = ((rows + 1) // 2 + 7) // 8 * 8
            if half < rows:
                return half
        return rows
    return (max_rows // 8) * 8


# --------------------------------------------------------------------------
# kernel
# --------------------------------------------------------------------------
def _gp_sample_kernel(mu_ref, ls_ref, noise_ref, out_ref):
    # mu_ref / ls_ref: (1, L) shared parameter tiles; noise_ref / out_ref: (TR, L).
    mu = mu_ref[...].astype(jnp.float32)
    scale = jnp.exp(ls_ref[...].astype(jnp.float32))       # exp -> EUP slot (free)
    noise = noise_ref[...].astype(jnp.float32)
    out_ref[...] = (mu + scale * noise).astype(out_ref.dtype)


# --------------------------------------------------------------------------
# wrapper
# --------------------------------------------------------------------------
def gaussian_prior_forward(init_mu, init_log_sigma, x, n, sample=None, *,
                           key=None, seed=None):
    """JAX/Pallas equivalent of GaussianPrior.forward.

    init_mu, init_log_sigma: (d,) parameters.
    x: (b, *, *) array -- only its leading batch dim is used.
    n: number of tokens per batch element.
    sample: optional pre-drawn noise of shape (b, n, d).
    key / seed: PRNG key or int seed used when sample is None.
    """
    b = x.shape[0]
    d = init_mu.shape[0]

    if sample is not None:
        sample = jnp.asarray(sample)
        out_dtype = jnp.promote_types(init_mu.dtype, sample.dtype)
        noise = sample
    else:
        out_dtype = init_mu.dtype
        if key is None:
            if seed is None:
                raise ValueError("need `key` or `seed` when sample is None")
            key = jax.random.PRNGKey(int(seed))
        # randn_like(mu): draw in the output dtype so the buffer can be
        # aliased onto the output and no extra HBM allocation is needed.
        noise = jax.random.normal(key, (b, n, d), dtype=out_dtype)

    # ---- lane-dense 2D view: (b, n, d) -> (rows, L), L % 128 == 0 if possible
    k = _periods_per_row(b, n, d)
    L = d * k
    rows = (b * n) // k

    mu_row = jnp.tile(init_mu.reshape(1, d), (1, k))         # (1, L) tiny
    ls_row = jnp.tile(init_log_sigma.reshape(1, d), (1, k))  # (1, L) tiny
    noise2d = noise.reshape(rows, L)

    tr = _choose_row_tile(rows, L, jnp.dtype(out_dtype).itemsize)
    grid = (pl.cdiv(rows, tr),)
    cparams = pltpu.CompilerParams(dimension_semantics=("parallel",))

    alias = {2: 0} if noise2d.dtype == jnp.dtype(out_dtype) else {}

    out2d = pl.pallas_call(
        _gp_sample_kernel,
        out_shape=jax.ShapeDtypeStruct((rows, L), out_dtype),
        grid=grid,
        in_specs=[
            pl.BlockSpec((1, L), lambda i: (0, 0)),          # mu (shared tile)
            pl.BlockSpec((1, L), lambda i: (0, 0)),          # log_sigma (shared)
            pl.BlockSpec((tr, L), lambda i: (i, 0)),         # noise
        ],
        out_specs=pl.BlockSpec((tr, L), lambda i: (i, 0)),
        input_output_aliases=alias,
        compiler_params=cparams,
    )(mu_row, ls_row, noise2d)

    return out2d.reshape(b, n, d)


# --------------------------------------------------------------------------
# demo / self-check
# --------------------------------------------------------------------------
if __name__ == "__main__":
    key = jax.random.PRNGKey(0)
    k_mu, k_ls, k_x, k_noise, k_rng = jax.random.split(key, 5)

    dim = 32
    b, n = 2, 8

    # init_mu ~ randn(dim)
    init_mu = jax.random.normal(k_mu, (dim,), dtype=jnp.float32)

    # init_log_sigma: xavier_uniform_ on (1, 1, dim) then squeeze
    # fan_in = fan_out = dim -> bound = sqrt(6 / (2 * dim))
    bound = (6.0 / (2.0 * dim)) ** 0.5
    init_log_sigma = jax.random.uniform(
        k_ls, (dim,), minval=-bound, maxval=bound, dtype=jnp.float32)

    # x only contributes its batch dimension
    x = jax.random.normal(k_x, (b, 4, 16), dtype=jnp.float32)

    # ---- path 1: sample provided ----
    noise = jax.random.normal(k_noise, (b, n, dim), dtype=jnp.float32)
    ref = init_mu[None, None, :] + jnp.exp(init_log_sigma)[None, None, :] * noise
    out = gaussian_prior_forward(init_mu, init_log_sigma, x, n, sample=noise)
    out = jax.block_until_ready(out)
    assert out.shape == (b, n, dim)
    assert jnp.allclose(out, ref, atol=1e-6, rtol=1e-6)

    # ---- path 2: sample=None (noise drawn with jax.random, streamed
    # through the same Pallas kernel). Statistically matches torch.randn_like
    # but does not bit-match it.
    out2 = gaussian_prior_forward(
        init_mu, init_log_sigma, x, n, sample=None, key=k_rng)
    out2 = jax.block_until_ready(out2)
    assert out2.shape == (b, n, dim)
    k2 = _periods_per_row(b, n, dim)
    noise2 = jax.random.normal(k_rng, (b, n, dim), dtype=jnp.float32)
    ref2 = init_mu[None, None, :] + jnp.exp(init_log_sigma)[None, None, :] * noise2
    assert jnp.allclose(out2, ref2, atol=1e-6, rtol=1e-6)
    assert bool(jnp.all(jnp.isfinite(out2)))

    print("KERNEL_OK")
</pallas_src>

<mosaic_0001>
module attributes {stable_mosaic.version = 11 : i64} {
  func.func @_gp_sample_kernel(%arg0: i32, %arg1: memref<1x512xf32, #tpu.memory_space<vmem>>, %arg2: memref<1x512xf32, #tpu.memory_space<vmem>>, %arg3: memref<1x512xf32, #tpu.memory_space<vmem>>, %arg4: memref<1x512xf32, #tpu.memory_space<vmem>>) attributes {dimension_semantics = [#tpu.dimension_semantics<parallel>], iteration_bounds = array<i64: 1>, scalar_prefetch = 0 : i64, scratch_operands = 0 : i64, tpu.core_type = #tpu.core_type<tc>, window_params = [{pipeline_mode = #tpu.pipeline_mode<synchronous>, transform_indices = @transform_0, window_bounds = array<i64: 1, 512>}, {pipeline_mode = #tpu.pipeline_mode<synchronous>, transform_indices = @transform_1, window_bounds = array<i64: 1, 512>}, {transform_indices = @transform_2, window_bounds = array<i64: 1, 512>}, {transform_indices = @transform_3, window_bounds = array<i64: 1, 512>}]} {
    %c0 = arith.constant 0 : index
    %c0_0 = arith.constant 0 : index
    %0 = vector.load %arg1[%c0, %c0_0] : memref<1x512xf32, #tpu.memory_space<vmem>>, vector<1x512xf32>
    %c0_1 = arith.constant 0 : index
    %c0_2 = arith.constant 0 : index
    %1 = vector.load %arg2[%c0_1, %c0_2] : memref<1x512xf32, #tpu.memory_space<vmem>>, vector<1x512xf32>
    %2 = math.exp %1 : vector<1x512xf32>
    %c0_3 = arith.constant 0 : index
    %c0_4 = arith.constant 0 : index
    %3 = vector.load %arg3[%c0_3, %c0_4] : memref<1x512xf32, #tpu.memory_space<vmem>>, vector<1x512xf32>
    %4 = arith.mulf %2, %3 : vector<1x512xf32>
    %5 = arith.addf %0, %4 : vector<1x512xf32>
    %c0_5 = arith.constant 0 : index
    %c0_6 = arith.constant 0 : index
    %6 = vector.load %arg4[%c0_5, %c0_6] : memref<1x512xf32, #tpu.memory_space<vmem>>, vector<1x512xf32>
    tpu.vector_store %arg4[%c0_5, %c0_6], %5 {strides = array<i32>} : memref<1x512xf32, #tpu.memory_space<vmem>>, vector<1x512xf32>,
    return
  }
  func.func @transform_0(%arg0: i32) -> (i32, i32) {
    %c0_i32 = arith.constant 0 : i32
    %c0_i32_0 = arith.constant 0 : i32
    %c0_i32_1 = arith.constant 0 : i32
    return %c0_i32, %c0_i32_0 : i32, i32
  }
  func.func @transform_1(%arg0: i32) -> (i32, i32) {
    %c0_i32 = arith.constant 0 : i32
    %c0_i32_0 = arith.constant 0 : i32
    %c0_i32_1 = arith.constant 0 : i32
    return %c0_i32, %c0_i32_0 : i32, i32
  }
  func.func @transform_2(%arg0: i32) -> (i32, i32) {
    %c0_i32 = arith.constant 0 : i32
    %c0_i32_0 = arith.constant 0 : i32
    return %arg0, %c0_i32 : i32, i32
  }
  func.func @transform_3(%arg0: i32) -> (i32, i32) {
    %c0_i32 = arith.constant 0 : i32
    %c0_i32_0 = arith.constant 0 : i32
    return %arg0, %c0_i32 : i32, i32
  }
}

</mosaic_0001>

<bundles_post_ra>
// kernel: tpu_custom_call.1
= control target key start
LH: loop header
LB: loop body
LE: loop exit
PB: predicated region body
PF: predicated region fallthrough
CT: control target
= control target key end

     0   :  { %8 = vsyncpa [#allocation3], 0  ;;  %s136_s0 = inlined_call_operand.vmem [shape: f32[1,512], index: 0, kind: input, shape index: {}]   ;;  %s137_s1 = inlined_call_operand.vmem [shape: f32[1,512], index: 1, kind: input, shape index: {}]   ;;  %s138_s2 = inlined_call_operand.hbm [shape: f32[1,512], index: 2, kind: input, shape index: {}, may-alias: {2,3}]   ;;  %s139_s3 = inlined_call_operand.hbm [shape: f32[1,512], index: 3, kind: output, shape index: {}, may-alias: {2,3}]  }
   0x1   :  { %9 = vsyncpa [#allocation4], 0  ;;  %s102_s12 = smov [#allocation2]  }
   0x2   :  { %s20_s13 = sshll.u32 %s102_s12, 4  ;;  %s21_s13 = int_to_ptr.vmem [resolvable:$true] %s20_s13 }
   0x3   :  { %s66_s14 = scalar_lea.vmem %s21_s13, 64  ;;  %p71_p1 = scmp.lt.s32.totalorder %s21_s13, %s21_s13 }
   0x4   :  { %p67_p0 = scmp.ne.s32.totalorder %s21_s13, %s66_s14  ;;  %p72_p2 = scmp.lt.s32.totalorder %s66_s14, %s66_s14 }
   0x6   :  { %p73_p3 = por %p72_p2, %p71_p1 }
   0x8   :  { %p74_p4 = pnand %p73_p3, %p67_p0 }
   0xa   :  { %77 = shalt.err (!%p74_p4)
}
   0xb   :  { %23 = dma.hbm_to_vmem [thread:$0]  %s138_s2, 64, %s21_s13, [#allocation3]  }
   0xc   :  { %98 = dma.done.wait [#allocation3], 64  }
   0xd   :  { %99 = vsyncadd [#allocation3], 4294967232  ;;  %v28_v0 = vld [vmem:[%s137_s1] sm:$0xf]  ;;  %v34_v3 = vlaneseq  ;;  %s103_s21 = smov [#allocation5]  }
   0xe   :  { %v29_v1 = vmul.f32 1.442695, %v28_v0  ;;  %v31_v2 = vld [vmem:[#allocation2] sm:$0xf]  ;;  %s45_s22 = sshll.u32 %s103_s21, 4  ;;  %s46_s22 = int_to_ptr.vmem [resolvable:$true] %s45_s22 }
   0xf   :  { %v27_v5 = vld [vmem:[%s136_s0] sm:$0xf]  ;;  %vm36_vm0 = vcmp.lt.s32.totalorder %v34_v3, 512  ;;  %s78_s2 = scalar_lea.vmem %s46_s22, 64  ;;  %p83_p6 = scmp.lt.s32.totalorder %s46_s22, %s46_s22 }
  0x10   :  { %56 = vpow2.f32 %v29_v1  ;;  %p79_p5 = scmp.ne.s32.totalorder %s46_s22, %s78_s2  ;;  %p84_p7 = scmp.lt.s32.totalorder %s78_s2, %s78_s2 }
  0x12   :  { %p85_p8 = por %p84_p7, %p83_p6 }
  0x14   :  { %p86_p9 = pnand %p85_p8, %p79_p5 }
  0x1d   :  { %v57_v4 = vpop.eup %56 }
  0x1e   :  { %v32_v6 = vmul.f32 %v57_v4, %v31_v2 }
  0x20   :  { %v33_v7 = vadd.f32 %v32_v6, %v27_v5 }
  0x22   :  { %38 = vst.msk [vmem:[#allocation5] sm:$0xf] %vm36_vm0, %v33_v7 }
  0x23   :  { %89 = shalt.err (!%p86_p9)
}
  0x24   :  { %48 = dma.vmem_to_hbm [thread:$0]  %s46_s22, 64, %s139_s3, [#allocation4]  }
  0x25   :  { %100 = dma.done.wait [#allocation4], 64  }
  0x26   :  { %101 = vsyncadd [#allocation4], 4294967232 }
  0x27   :  { %52 = vsyncpa [#allocation3], 1 }
  0x28   :  { %53 = vsyncpa [#allocation4], 1 }

</bundles_post_ra>
